<compile_context>
chip_gen: v6e
topology: v6e:2x2x1
jax: 0.10.0
libtpu: 0.0.40
codegen_flags: <defaults>
</compile_context>

<pallas_src>
import functools

import jax
import jax.numpy as jnp
from jax.experimental import pallas as pl
from jax.experimental.pallas import tpu as pltpu

_VMEM_LIMIT = 48 * 1024 * 1024  # explicit scoped-VMEM budget (< v7x 64 MiB physical)


def _round_up(v, m):
    return -(-v // m) * m


def _pad2d(a, rows, cols):
    pr, pc = rows - a.shape[0], cols - a.shape[1]
    if pr == 0 and pc == 0:
        return a
    return jnp.pad(a, ((0, pr), (0, pc)))


@functools.lru_cache(maxsize=None)
def _tn_base():
    """256-wide N tiles on v6e/v7x (2x256x256 MXU), 128 on v5e and older."""
    try:
        kind = jax.devices()[0].device_kind.lower()
    except Exception:
        kind = ""
    return 128 if any(t in kind for t in ("v2", "v3", "v4", "v5")) else 256


def _pick_m_tiling(M):
    Mp = _round_up(M, 8)
    if Mp <= 128:
        return Mp, Mp
    if Mp <= 512:
        if Mp % 16 == 0:          # >=2 M-tiles -> both v7x TensorCores get work
            return Mp, Mp // 2
        return Mp, Mp
    for tm in (512, 256, 128, 64, 32, 16, 8):
        if Mp % tm == 0:
            return Mp, tm
    return Mp, 8


# ----------------------------------------------------------------------------
# Pallas kernels
# ----------------------------------------------------------------------------
def _apply_act(y, act):
    if act == "relu":
        return jnp.maximum(y, 0.0)
    if act == "sigmoid":
        return jax.nn.sigmoid(y)
    return y


def _gemm_kernel(x_ref, w_ref, o_ref, *, act):
    """o = act(x @ w); bf16 operands on the MXU, fp32 accumulation (BN folded into w)."""
    y = jnp.dot(x_ref[...], w_ref[...], preferred_element_type=jnp.float32)
    o_ref[...] = _apply_act(y, act).astype(o_ref.dtype)


def _gemm_bias_kernel(x_ref, w_ref, b_ref, o_ref, *, act):
    """o = act(x @ w + b); bias is the folded-BN shift (scale already in w)."""
    y = jnp.dot(x_ref[...], w_ref[...], preferred_element_type=jnp.float32)
    y = y + b_ref[...]
    o_ref[...] = _apply_act(y, act).astype(o_ref.dtype)


@functools.lru_cache(maxsize=None)
def _gemm_call(Mp, K, Np, tm, tn, act, out_dtype, has_bias):
    grid = (Mp // tm, Np // tn)
    in_specs = [
        pl.BlockSpec((tm, K), lambda i, j: (i, 0)),   # full-K block, no K pad
        pl.BlockSpec((K, tn), lambda i, j: (0, j)),
    ]
    if has_bias:
        in_specs.append(pl.BlockSpec((1, tn), lambda i, j: (0, j)))
        kernel = functools.partial(_gemm_bias_kernel, act=act)
    else:
        kernel = functools.partial(_gemm_kernel, act=act)
    call = pl.pallas_call(
        kernel,
        out_shape=jax.ShapeDtypeStruct((Mp, Np), out_dtype),
        grid_spec=pltpu.PrefetchScalarGridSpec(
            num_scalar_prefetch=0,
            grid=grid,
            in_specs=in_specs,
            out_specs=pl.BlockSpec((tm, tn), lambda i, j: (i, j)),
        ),
        compiler_params=pltpu.CompilerParams(
            dimension_semantics=("parallel", "parallel"),
            vmem_limit_bytes=_VMEM_LIMIT),
    )
    return jax.jit(call)


def pallas_matmul(x, w, bias=None, act="none", out_dtype=jnp.bfloat16):
    """Fused act(x @ w [+ bias]); BN scale already folded into w; minimal padding."""
    M, K = x.shape
    N = w.shape[1]
    Mp, tm = _pick_m_tiling(M)
    Np = _round_up(N, 128)
    base = _tn_base()
    tn = base if Np % base == 0 else 128
    xp = _pad2d(x, Mp, K).astype(jnp.bfloat16)
    wp = _pad2d(w, K, Np).astype(jnp.bfloat16)
    args = [xp, wp]
    if bias is not None:
        args.append(_pad2d(bias.astype(jnp.float32).reshape(1, N), 1, Np))
    out = _gemm_call(Mp, K, Np, tm, tn, act, out_dtype, bias is not None)(*args)
    if Mp != M or Np != N:
        out = out[:M, :N]
    return out


def _dw_s1_kernel(x_ref, w_ref, b_ref, o_ref, *, relu):
    """Stride-1 3x3 depthwise conv on a block of frames; the sublane-shifting dw slice
    is hoisted so only 3 shifted windows (not 9) are materialised."""
    F, H, W, C = o_ref.shape
    acc = jnp.zeros((F, H, W, C), jnp.float32)
    for dw in range(3):
        xw = x_ref[:, :, dw:dw + W, :].astype(jnp.float32)
        for dh in range(3):
            acc = acc + xw[:, dh:dh + H, :, :] * w_ref[3 * dh + dw]
    y = acc + b_ref[...]
    if relu:
        y = jnp.maximum(y, 0.0)
    o_ref[...] = y.astype(o_ref.dtype)


@functools.lru_cache(maxsize=None)
def _dw_s1_call(N, G, H, W, C, relu):
    F = N // G
    call = pl.pallas_call(
        functools.partial(_dw_s1_kernel, relu=relu),
        out_shape=jax.ShapeDtypeStruct((N, H, W, C), jnp.bfloat16),
        grid_spec=pltpu.PrefetchScalarGridSpec(
            num_scalar_prefetch=0,
            grid=(G,),
            in_specs=[
                pl.BlockSpec((F, H + 2, W + 2, C), lambda g: (g, 0, 0, 0)),
                pl.BlockSpec((9, 1, C), lambda g: (0, 0, 0)),
                pl.BlockSpec((1, C), lambda g: (0, 0)),
            ],
            out_specs=pl.BlockSpec((F, H, W, C), lambda g: (g, 0, 0, 0)),
        ),
        compiler_params=pltpu.CompilerParams(
            dimension_semantics=("parallel",), vmem_limit_bytes=_VMEM_LIMIT),
    )
    return jax.jit(call)


def _dw_s2_kernel(ph_ref, w_ref, b_ref, o_ref, *, relu):
    """Stride-2 3x3 depthwise conv on a block of frames; input pre-split into the 4
    even/odd phases so taps are unstrided slices; only 2 sublane-shifted columns."""
    F, Ho, Wo, C = o_ref.shape
    cols = [ph_ref[:, :, 0:Wo, :].astype(jnp.float32),
            ph_ref[:, :, 1:Wo + 1, :].astype(jnp.float32)]
    acc = jnp.zeros((F, Ho, Wo, C), jnp.float32)
    for dh in range(3):
        for dw in range(3):
            pidx = (dh % 2) * 2 + (dw % 2)
            r0 = pidx * (Ho + 1) + dh // 2
            acc = acc + cols[dw // 2][:, r0:r0 + Ho, :, :] * w_ref[3 * dh + dw]
    y = acc + b_ref[...]
    if relu:
        y = jnp.maximum(y, 0.0)
    o_ref[...] = y.astype(o_ref.dtype)


@functools.lru_cache(maxsize=None)
def _dw_s2_call(N, G, Ho, Wo, C, relu):
    F = N // G
    call = pl.pallas_call(
        functools.partial(_dw_s2_kernel, relu=relu),
        out_shape=jax.ShapeDtypeStruct((N, Ho, Wo, C), jnp.bfloat16),
        grid_spec=pltpu.PrefetchScalarGridSpec(
            num_scalar_prefetch=0,
            grid=(G,),
            in_specs=[
                pl.BlockSpec((F, 4 * (Ho + 1), Wo + 1, C), lambda g: (g, 0, 0, 0)),
                pl.BlockSpec((9, 1, C), lambda g: (0, 0, 0)),
                pl.BlockSpec((1, C), lambda g: (0, 0)),
            ],
            out_specs=pl.BlockSpec((F, Ho, Wo, C), lambda g: (g, 0, 0, 0)),
        ),
        compiler_params=pltpu.CompilerParams(
            dimension_semantics=("parallel",), vmem_limit_bytes=_VMEM_LIMIT),
    )
    return jax.jit(call)


def _attn_kernel(yq_ref, xk_ref, wq_ref, wk_ref, o_ref):
    """Fused q/k projection + scaled softmax(q k^T) + sum over query positions.
    The softmax scale is folded into wq host-side."""
    yq = yq_ref[0]                                   # (Nq, dq) bf16
    xk = xk_ref[0]                                   # (Nk, dk) bf16
    q = jnp.dot(yq, wq_ref[...], preferred_element_type=jnp.float32)
    k = jnp.dot(xk, wk_ref[...], preferred_element_type=jnp.float32)
    s = jax.lax.dot_general(q.astype(jnp.bfloat16), k.astype(jnp.bfloat16),
                            (((1,), (1,)), ((), ())),
                            preferred_element_type=jnp.float32)   # (Nq, Nk)
    s = s - jnp.max(s, axis=-1, keepdims=True)
    p = jnp.exp(s)
    p = p * pl.reciprocal(jnp.sum(p, axis=-1, keepdims=True), approx=True)
    o_ref[...] = jnp.sum(p, axis=0, keepdims=True)[None]          # (1, 1, Nk)


@functools.lru_cache(maxsize=None)
def _attn_call(B, Nq, Nk, dq, dk, D):
    call = pl.pallas_call(
        _attn_kernel,
        out_shape=jax.ShapeDtypeStruct((B, 1, Nk), jnp.float32),
        grid_spec=pltpu.PrefetchScalarGridSpec(
            num_scalar_prefetch=0,
            grid=(B,),
            in_specs=[
                pl.BlockSpec((1, Nq, dq), lambda b: (b, 0, 0)),
                pl.BlockSpec((1, Nk, dk), lambda b: (b, 0, 0)),
                pl.BlockSpec((dq, D), lambda b: (0, 0)),
                pl.BlockSpec((dk, D), lambda b: (0, 0)),
            ],
            out_specs=pl.BlockSpec((1, 1, Nk), lambda b: (b, 0, 0)),
        ),
        compiler_params=pltpu.CompilerParams(
            dimension_semantics=("parallel",), vmem_limit_bytes=_VMEM_LIMIT),
    )
    return jax.jit(call)


# ----------------------------------------------------------------------------
# Layer wrappers (im2col / padding / reshapes are glue; compute is in Pallas)
# ----------------------------------------------------------------------------
def conv2d_bn(x, w, scale, bias, stride, pad, relu=True):
    N, H, W, Cin = x.shape
    kh, kw, _, Cout = w.shape
    xb = x.astype(jnp.bfloat16)                       # bf16 im2col patches
    xp = jnp.pad(xb, ((0, 0), (pad, pad), (pad, pad), (0, 0)))
    Ho = (H + 2 * pad - kh) // stride + 1
    Wo = (W + 2 * pad - kw) // stride + 1
    cols = []
    for dh in range(kh):
        for dw_ in range(kw):
            cols.append(xp[:, dh:dh + stride * (Ho - 1) + 1:stride,
                            dw_:dw_ + stride * (Wo - 1) + 1:stride, :])
    patches = jnp.concatenate(cols, axis=-1).reshape(N * Ho * Wo, kh * kw * Cin)
    wf = w.reshape(kh * kw * Cin, Cout) * scale[None, :]      # fold BN scale (f32)
    y = pallas_matmul(patches, wf, bias=bias, act="relu" if relu else "none")
    return y.reshape(N, Ho, Wo, Cout)


def pointwise_conv_bn(x, w, scale, bias, relu=True):
    N, H, W, Cin = x.shape
    Cout = w.shape[1]
    wf = w * scale[None, :]
    y = pallas_matmul(x.reshape(N * H * W, Cin), wf, bias=bias,
                      act="relu" if relu else "none")
    return y.reshape(N, H, W, Cout)


def depthwise_conv_bn(x, w, scale, bias, stride, relu, multiplier=1):
    """3x3 depthwise conv (pad=1) + folded BN (+ReLU); taps read inside the kernel,
    all frames processed in 1-2 grid steps."""
    N, H, W, Cin = x.shape
    C = w.shape[-1]
    assert C == Cin * multiplier
    if multiplier > 1:  # PyTorch groups=Cin with Cout=Cin*mult -> repeat-interleaved
        x = jnp.repeat(x, multiplier, axis=-1)
    wf = (w.reshape(9, 1, C) * scale.reshape(1, 1, C)).astype(jnp.float32)
    bf = bias.reshape(1, C).astype(jnp.float32)
    xb = x.astype(jnp.bfloat16)
    G = 2 if (N % 2 == 0 and N >= 2) else 1           # 2 parallel steps for megacore
    if stride == 1:
        xp = jnp.pad(xb, ((0, 0), (1, 1), (1, 1), (0, 0)))
        return _dw_s1_call(N, G, H, W, C, bool(relu))(xp, wf, bf)
    # stride 2: single 1x re-layout into even/odd phases (no 9x tap tensor).
    Ho = (H - 1) // 2 + 1
    Wo = (W - 1) // 2 + 1
    xp = jnp.pad(xb, ((0, 0), (1, 2 * Ho + 1 - H), (1, 2 * Wo + 1 - W), (0, 0)))
    ph = xp.reshape(N, Ho + 1, 2, Wo + 1, 2, C).transpose(0, 2, 4, 1, 3, 5)
    ph = ph.reshape(N, 4 * (Ho + 1), Wo + 1, C)
    return _dw_s2_call(N, G, Ho, Wo, C, bool(relu))(ph, wf, bf)


def conv1d_bn_relu(x, w, scale, bias, pad):
    B, L, Cin = x.shape
    k, _, Cout = w.shape
    xb = x.astype(jnp.bfloat16)
    xp = jnp.pad(xb, ((0, 0), (pad, pad), (0, 0)))
    Lo = L + 2 * pad - k + 1
    cols = [xp[:, d:d + Lo, :] for d in range(k)]
    patches = jnp.concatenate(cols, axis=-1).reshape(B * Lo, k * Cin)
    wf = w.reshape(k * Cin, Cout) * scale[None, :]
    y = pallas_matmul(patches, wf, bias=bias, act="relu")
    return y.reshape(B, Lo, Cout)


def conv1d_block_audio_apply(x, p):
    # Conv1d(k=3, pad=0) + BN + ReLU + MaxPool1d(kernel=2, stride=1)  (stride=1 as in ref)
    y = conv1d_bn_relu(x, p["w"], p["s"], p["b"], pad=0)
    return jnp.maximum(y[:, :-1, :], y[:, 1:, :])


def conv1d_block_apply(x, p):
    # Conv1d(k=3, pad=1) + BN + ReLU
    return conv1d_bn_relu(x, p["w"], p["s"], p["b"], pad=1)


def maxpool2d_3x3_s2_p1(x):
    N, H, W, C = x.shape
    neg = jnp.finfo(x.dtype).min
    xp = jnp.pad(x, ((0, 0), (1, 1), (1, 1), (0, 0)), constant_values=neg)
    Ho = (H + 2 - 3) // 2 + 1
    Wo = (W + 2 - 3) // 2 + 1
    out = None
    for dh in range(3):
        for dw in range(3):
            t = xp[:, dh:dh + 2 * (Ho - 1) + 1:2, dw:dw + 2 * (Wo - 1) + 1:2, :]
            out = t if out is None else jnp.maximum(out, t)
    return out


def channel_shuffle(x, groups=2):
    N, H, W, C = x.shape
    x = x.reshape(N, H, W, groups, C // groups)
    x = jnp.swapaxes(x, 3, 4)
    return x.reshape(N, H, W, C)


def _branch2(x, p, stride):
    # TODO(synk): fuse pw1 -> dw -> pw2 into one Pallas kernel for the 2x2/1x1 stages.
    y = pointwise_conv_bn(x, p["b2_pw1_w"], p["b2_pw1_s"], p["b2_pw1_b"], relu=True)
    y = depthwise_conv_bn(y, p["b2_dw_w"], p["b2_dw_s"], p["b2_dw_b"], stride, relu=False)
    y = pointwise_conv_bn(y, p["b2_pw2_w"], p["b2_pw2_s"], p["b2_pw2_b"], relu=True)
    return y


def inverted_residual_apply(x, p):
    stride = p["stride"]
    if stride == 1:
        half = x.shape[-1] // 2
        x1, x2 = x[..., :half], x[..., half:]
        out = jnp.concatenate([x1, _branch2(x2, p, stride)], axis=-1)
    else:
        b1 = depthwise_conv_bn(x, p["b1_dw_w"], p["b1_dw_s"], p["b1_dw_b"],
                               stride, relu=False)
        b1 = pointwise_conv_bn(b1, p["b1_pw_w"], p["b1_pw_s"], p["b1_pw_b"], relu=True)
        out = jnp.concatenate([b1, _branch2(x, p, stride)], axis=-1)
    return channel_shuffle(out, 2)


def stage_apply(x, blocks):
    for p in blocks:
        x = inverted_residual_apply(x, p)
    return x


def local_apply(x, p):
    # TODO(synk): original LocalFeatureExtractor hard-codes 28px patches (224px
    # faces); here patches are the generic H//2 x W//2 quadrants.
    N, H, W, C = x.shape
    hh, hw = H // 2, W // 2
    patches = [x[:, :hh, :hw], x[:, hh:, :hw], x[:, :hh, hw:], x[:, hh:, hw:]]
    outs = []
    for q, patch in zip(p["branches"], patches):
        y = depthwise_conv_bn(patch, q["w1"], q["s1"], q["b1"], stride=2,
                              relu=True, multiplier=4)
        y = depthwise_conv_bn(y, q["w2"], q["s2"], q["b2"], stride=1, relu=True)
        outs.append(y)
    left = jnp.concatenate([outs[0], outs[1]], axis=1)
    right = jnp.concatenate([outs[2], outs[3]], axis=1)
    return jnp.concatenate([left, right], axis=2)


def modulator_apply(x, p):
    # SE-style squeeze/excite (bias-free linears); identity-epilogue GEMMs.
    y = jnp.mean(x.astype(jnp.float32), axis=(1, 2))
    y = pallas_matmul(y, p["fc1_w"], act="relu")
    y = pallas_matmul(y, p["fc2_w"], act="sigmoid")
    return x * y[:, None, None, :].astype(x.dtype)


def attention_weights_sum(x_kv, y_q, p):
    # timm-style cross Attention(x=key source, y=query source), num_heads=1.
    # Returns attention weights summed over query positions: shape (B, Nk).
    # TODO(synk): opendr Attention internals assumed: bias-free q/k linears + scaled softmax.
    B, Nk, dk = x_kv.shape
    _, Nq, dq = y_q.shape
    D = p["wq"].shape[1]
    scale = float(D) ** -0.5
    wq = (p["wq"] * scale).astype(jnp.bfloat16)       # fold softmax scale into wq
    wk = p["wk"].astype(jnp.bfloat16)
    out = _attn_call(B, Nq, Nk, dq, dk, D)(
        y_q.astype(jnp.bfloat16), x_kv.astype(jnp.bfloat16), wq, wk)
    return out[:, 0, :]


# ----------------------------------------------------------------------------
# Full forward pass: MultiModalCNN.forward_int_attention (fusion='ia')
# ----------------------------------------------------------------------------
def multimodal_cnn_forward(P, x_audio, x_visual):
    seq = P["seq"]
    a = x_audio.astype(jnp.bfloat16)
    vis = x_visual.astype(jnp.bfloat16)
    # -------- audio stage 1 --------
    a = conv1d_block_audio_apply(a, P["a0"])
    a = conv1d_block_audio_apply(a, P["a1"])                  # (B, La, 128) bf16
    # -------- visual features (EfficientFaceTemporal.forward_features) --------
    v = conv2d_bn(vis, P["conv1_w"], P["conv1_s"], P["conv1_b"],
                  stride=2, pad=1, relu=True)
    v = maxpool2d_3x3_s2_p1(v)
    s2 = stage_apply(v, P["stage2"])
    v = modulator_apply(s2, P["modulator"]) + local_apply(v, P["local"])
    v = stage_apply(v, P["stage3"])
    v = stage_apply(v, P["stage4"])
    v = pointwise_conv_bn(v, P["conv5_w"], P["conv5_s"], P["conv5_b"], relu=True)
    v = jnp.mean(v.astype(jnp.float32), axis=(1, 2)).astype(jnp.bfloat16)  # (B*seq, 1024)
    # -------- visual stage 1 --------
    assert v.shape[0] % seq == 0, "Batch size is not a multiple of sequence length."
    n = v.shape[0] // seq
    v = v.reshape(n, seq, v.shape[-1])                        # (B, Lv, 1024)
    v = conv1d_block_apply(v, P["v0"])
    v = conv1d_block_apply(v, P["v1"])                        # (B, Lv, 64)
    # -------- intermediate attention fusion ('ia') --------
    h_av = attention_weights_sum(v, a, P["av"])               # (B, Lv)
    h_va = attention_weights_sum(a, v, P["va"])               # (B, La)
    a = a * h_va[:, :, None].astype(a.dtype)
    v = v * h_av[:, :, None].astype(v.dtype)
    # -------- stage 2 --------
    a = conv1d_block_audio_apply(a, P["a2"])
    a = conv1d_block_audio_apply(a, P["a3"])                  # (B, La2, 128)
    v = conv1d_block_apply(v, P["v2"])
    v = conv1d_block_apply(v, P["v3"])                        # (B, Lv, 128)
    audio_pooled = jnp.mean(a.astype(jnp.float32), axis=1)
    video_pooled = jnp.mean(v.astype(jnp.float32), axis=1)
    x = jnp.concatenate([audio_pooled, video_pooled], axis=-1)   # (B, 256) f32
    return pallas_matmul(x, P["cls_w"], bias=P["cls_b"], act="none",
                         out_dtype=jnp.float32)


# ----------------------------------------------------------------------------
# Deterministic parameter construction (synthetic weights; eval-mode BN folded)
# ----------------------------------------------------------------------------
class ParamGen:
    def __init__(self, seed):
        self._key = jax.random.PRNGKey(seed)

    def _next(self):
        self._key, sub = jax.random.split(self._key)
        return sub

    def take(self, shape, std=None):
        if std is None:
            fan_in = 1
            for d in shape[:-1]:
                fan_in *= d
            std = 1.0 / (max(fan_in, 1) ** 0.5)
        return std * jax.random.normal(self._next(), shape, jnp.float32)

    def bn(self, C, eps=1e-5):
        gamma = 1.0 + 0.1 * jax.random.normal(self._next(), (C,), jnp.float32)
        beta = 0.1 * jax.random.normal(self._next(), (C,), jnp.float32)
        mean = 0.1 * jax.random.normal(self._next(), (C,), jnp.float32)
        var = 1.0 + 0.1 * jnp.abs(jax.random.normal(self._next(), (C,), jnp.float32))
        scale = gamma / jnp.sqrt(var + eps)
        shift = beta - mean * scale
        return scale, shift


def make_ir_params(gen, inp, oup, stride):
    bf = oup // 2
    p = {"stride": stride}
    if stride > 1:
        p["b1_dw_w"] = gen.take((3, 3, inp))
        p["b1_dw_s"], p["b1_dw_b"] = gen.bn(inp)
        p["b1_pw_w"] = gen.take((inp, bf))
        p["b1_pw_s"], p["b1_pw_b"] = gen.bn(bf)
    in2 = inp if stride > 1 else bf
    p["b2_pw1_w"] = gen.take((in2, bf))
    p["b2_pw1_s"], p["b2_pw1_b"] = gen.bn(bf)
    p["b2_dw_w"] = gen.take((3, 3, bf))
    p["b2_dw_s"], p["b2_dw_b"] = gen.bn(bf)
    p["b2_pw2_w"] = gen.take((bf, bf))
    p["b2_pw2_s"], p["b2_pw2_b"] = gen.bn(bf)
    return p


def build_params(seed=42, num_classes=8, seq=8):
    gen = ParamGen(seed)
    P = {"seq": seq}
    # AudioCNNPool conv1d blocks
    for name, (ci, co) in zip(["a0", "a1", "a2", "a3"],
                              [(10, 64), (64, 128), (128, 256), (256, 128)]):
        s, b = gen.bn(co)
        P[name] = {"w": gen.take((3, ci, co)), "s": s, "b": b}
    # EfficientFaceTemporal backbone
    P["conv1_w"] = gen.take((3, 3, 3, 29))
    P["conv1_s"], P["conv1_b"] = gen.bn(29)
    stages_repeats, stages_out = [4, 8, 4], [29, 116, 232, 464, 1024]
    in_c = 29
    for name, rep, out_c in zip(["stage2", "stage3", "stage4"],
                                stages_repeats, stages_out[1:4]):
        blocks = [make_ir_params(gen, in_c, out_c, 2)]
        for _ in range(rep - 1):
            blocks.append(make_ir_params(gen, out_c, out_c, 1))
        P[name] = blocks
        in_c = out_c
    # LocalFeatureExtractor(29, 116, 1): 4 branches of 2 depthwise convs each
    branches = []
    for _ in range(4):
        s1, b1 = gen.bn(116)
        s2, b2 = gen.bn(116)
        branches.append({"w1": gen.take((3, 3, 116)), "s1": s1, "b1": b1,
                         "w2": gen.take((3, 3, 116)), "s2": s2, "b2": b2})
    P["local"] = {"branches": branches}
    # Modulator(116): SE-style squeeze/excite
    P["modulator"] = {"fc1_w": gen.take((116, 116 // 16)),
                      "fc2_w": gen.take((116 // 16, 116))}
    P["conv5_w"] = gen.take((464, 1024))
    P["conv5_s"], P["conv5_b"] = gen.bn(1024)
    for name, (ci, co) in zip(["v0", "v1", "v2", "v3"],
                              [(1024, 64), (64, 64), (64, 128), (128, 128)]):
        s, b = gen.bn(co)
        P[name] = {"w": gen.take((3, ci, co)), "s": s, "b": b}
    # fusion 'ia' attention (q/k projections, bias-free, num_heads=1)
    P["av"] = {"wq": gen.take((128, 128)), "wk": gen.take((64, 128))}
    P["va"] = {"wq": gen.take((64, 64)), "wk": gen.take((128, 64))}
    # final classifier Linear(2*128, num_classes)
    P["cls_w"] = gen.take((256, num_classes))
    P["cls_b"] = gen.take((num_classes,), std=0.05)
    return P


if __name__ == "__main__":
    num_classes, seq = 8, 8
    B, L_audio, H, W = 2, 20, 32, 32

    params = build_params(seed=42, num_classes=num_classes, seq=seq)

    key = jax.random.PRNGKey(0)
    ka, kv = jax.random.split(key)
    # layout: audio (B, L, C) == torch (B, 10, L); visual NHWC == torch NCHW
    x_audio = jax.random.normal(ka, (B, L_audio, 10), jnp.float32)
    x_visual = jax.random.normal(kv, (B * seq, H, W, 3), jnp.float32)

    out = multimodal_cnn_forward(params, x_audio, x_visual)
    out = jax.block_until_ready(out)
    assert out.shape == (B, num_classes), out.shape
    assert bool(jnp.all(jnp.isfinite(out)))
    print("KERNEL_OK")
</pallas_src>

<mosaic_0001>
module attributes {stable_mosaic.version = 11 : i64} {
  func.func @_gemm_bias_kernel(%arg0: i32, %arg1: i32, %arg2: memref<40x30xbf16, #tpu.memory_space<vmem>>, %arg3: memref<30x128xbf16, #tpu.memory_space<vmem>>, %arg4: memref<1x128xf32, #tpu.memory_space<vmem>>, %arg5: memref<40x128xbf16, #tpu.memory_space<vmem>>) attributes {dimension_semantics = [#tpu.dimension_semantics<parallel>, #tpu.dimension_semantics<parallel>], iteration_bounds = array<i64: 1, 1>, scalar_prefetch = 0 : i64, scratch_operands = 0 : i64, tpu.core_type = #tpu.core_type<tc>, window_params = [{transform_indices = @transform_0, window_bounds = array<i64: 40, 30>}, {transform_indices = @transform_1, window_bounds = array<i64: 30, 128>}, {transform_indices = @transform_2, window_bounds = array<i64: 1, 128>}, {transform_indices = @transform_3, window_bounds = array<i64: 40, 128>}]} {
    %c0 = arith.constant 0 : index
    %c0_0 = arith.constant 0 : index
    %0 = vector.load %arg2[%c0, %c0_0] : memref<40x30xbf16, #tpu.memory_space<vmem>>, vector<40x30xbf16>
    %c0_1 = arith.constant 0 : index
    %c0_2 = arith.constant 0 : index
    %1 = vector.load %arg3[%c0_1, %c0_2] : memref<30x128xbf16, #tpu.memory_space<vmem>>, vector<30x128xbf16>
    %cst = arith.constant dense<0.000000e+00> : vector<40x128xf32>
    %2 = tpu.matmul %0, %1, %cst {dimension_numbers = #tpu.dot_dimension_numbers<[1], [0], [0], [1], [0, 0, 1, 1], [], []>} : vector<40x30xbf16>, vector<30x128xbf16>, vector<40x128xf32> -> vector<40x128xf32>
    %c0_3 = arith.constant 0 : index
    %c0_4 = arith.constant 0 : index
    %3 = vector.load %arg4[%c0_3, %c0_4] : memref<1x128xf32, #tpu.memory_space<vmem>>, vector<1x128xf32>
    %4 = vector.broadcast %3 : vector<1x128xf32> to vector<40x128xf32>
    %5 = arith.addf %2, %4 : vector<40x128xf32>
    %cst_5 = arith.constant 0.000000e+00 : f32
    %6 = vector.broadcast %cst_5 : f32 to vector<40x128xf32>
    %7 = arith.maximumf %5, %6 : vector<40x128xf32>
    %8 = arith.truncf %7 : vector<40x128xf32> to vector<40x128xbf16>
    %c0_6 = arith.constant 0 : index
    %c0_7 = arith.constant 0 : index
    %9 = vector.load %arg5[%c0_6, %c0_7] : memref<40x128xbf16, #tpu.memory_space<vmem>>, vector<40x128xbf16>
    tpu.vector_store %arg5[%c0_6, %c0_7], %8 {strides = array<i32>} : memref<40x128xbf16, #tpu.memory_space<vmem>>, vector<40x128xbf16>,
    return
  }
  func.func @transform_0(%arg0: i32, %arg1: i32) -> (i32, i32) {
    %c0_i32 = arith.constant 0 : i32
    %c0_i32_0 = arith.constant 0 : i32
    return %arg0, %c0_i32 : i32, i32
  }
  func.func @transform_1(%arg0: i32, %arg1: i32) -> (i32, i32) {
    %c0_i32 = arith.constant 0 : i32
    %c0_i32_0 = arith.constant 0 : i32
    return %c0_i32, %arg1 : i32, i32
  }
  func.func @transform_2(%arg0: i32, %arg1: i32) -> (i32, i32) {
    %c0_i32 = arith.constant 0 : i32
    %c0_i32_0 = arith.constant 0 : i32
    return %c0_i32, %arg1 : i32, i32
  }
  func.func @transform_3(%arg0: i32, %arg1: i32) -> (i32, i32) {
    %c0_i32 = arith.constant 0 : i32
    return %arg0, %arg1 : i32, i32
  }
}

</mosaic_0001>

<bundles_post_ra>
// kernel: tpu_custom_call.1
= control target key start
LH: loop header
LB: loop body
LE: loop exit
PB: predicated region body
PF: predicated region fallthrough
CT: control target
= control target key end

     0   :  { %vm66_vm0 = vcmask 1046528   ;;  %v260_v0 = vmov 0.0   ;;  %vm261_vm1 = vmmov 0   ;;  %s309_s0 = inlined_call_operand.vmem [shape: bf16[40,30], index: 0, kind: input, shape index: {}]   ;;  %s310_s1 = inlined_call_operand.vmem [shape: bf16[30,128], index: 1, kind: input, shape index: {}]   ;;  %s311_s2 = inlined_call_operand.vmem [shape: f32[1,128], index: 2, kind: input, shape index: {}]   ;;  %s312_s3 = inlined_call_operand.hbm [shape: bf16[40,128], index: 3, kind: output, shape index: {}]  }
   0x1   :  { %208 = vmatprep.subr.bf16.mxu0 %v260_v0  ;;  %224 = vmatprep.subr.bf16.mxu1 %v260_v0  ;;  %v233_v1 = vld [vmem:[%s310_s1 + $0x8] sm:$0x7f]   ;;  %v234_v3 = vld [vmem:[%s310_s1] sm:$0xff]  }
   0x2   :  { %v68_v2 = vsel %vm66_vm0, %v233_v1, 0  ;;  %212 = vmatprep.mubr.msk.bf16.mxu0 %vm261_vm1, %v260_v0  ;;  %216 = vmatprep.mubr.msk.bf16.mxu1 %vm261_vm1, %v260_v0 }
   0x3   :  { %209 = vmatpush3.bf16.msra.mxu0 %v68_v2  ;;  %226 = vmatpush3.bf16.msra.mxu1 %v68_v2 }
   0x4   :  { %210 = vmatprep.subr.bf16.mxu0 %v260_v0  ;;  %225 = vmatprep.subr.bf16.mxu1 %v260_v0 }
   0x5   :  { %8 = vsyncpa [#allocation3], 0  ;;  %v235_v4 = vld [vmem:[%s309_s0] sm:$0xff]   ;;  %v236_v5 = vld [vmem:[%s309_s0 + $0x8] sm:$0xff]   ;;  %vm56_vm2 = vcmask 244736  }
   0x6   :  { %v237_v6 = vld [vmem:[%s309_s0 + $0x10] ss:$0 sps:$4 sm:$0xff]   ;;  %v173_v7 = vld [vmem:[%s311_s2] ss:$0 sm:$0xff]  ;;  %s262_s0 = smov [#allocation2]  }
   0x7   :  { %211 = vmatpush3.bf16.msra.mxu0 %v234_v3  ;;  %227 = vmatpush3.bf16.msra.mxu1 %v234_v3  ;;  %s162_s2 = sshll.u32 %s262_s0, 4  ;;  %s163_s2 = int_to_ptr.vmem [resolvable:$true] %s162_s2 }
   0x8   :  { %s238_s23 = scalar_lea.vmem %s163_s2, 320  ;;  %p243_p1 = scmp.lt.s32.totalorder %s163_s2, %s163_s2 }
   0x9   :  { %p239_p0 = scmp.ne.s32.totalorder %s163_s2, %s238_s23  ;;  %p244_p2 = scmp.lt.s32.totalorder %s238_s23, %s238_s23 }
   0xa   :  { %213 = vmatmul.mubr.msk.bf16.vlgmr.msra.gmra.mxu0 %vm56_vm2, %v235_v4  ;;  %217 = vmatmul.mubr.msk.bf16.vlgmr.msra.gmra.mxu1 %vm56_vm2, %v236_v5 }
   0xb   :  { %220 = vmatprep.mubr.msk.bf16.mxu1 %vm261_vm1, %v260_v0  ;;  %p245_p3 = por %p244_p2, %p243_p1 }
   0xd   :  { %p246_p4 = pnand %p245_p3, %p239_p0 }
  0x12   :  { %221 = vmatmul.mubr.msk.bf16.gmra.mxu1 %vm56_vm2, %v237_v6 }
  0xca   :  { %v104_v8 = vpop.f32.mrf.mxu0  ;;  %v112_v9 = vpop.f32.mrf.mxu1 }
  0xcb   :  { %v105_v10 = vadd.f32 %v173_v7, %v104_v8  ;;  %v113_v13 = vadd.f32 %v173_v7, %v112_v9 }
  0xcc   :  { %v214_v11 = vpop.f32.mrf.mxu0  ;;  %v218_v12 = vpop.f32.mrf.mxu1 }
  0xcd   :  { %v126_v16 = vmax.f32 %v105_v10, 0.0  ;;  %v128_v21 = vmax.f32 %v113_v13, 0.0 }
  0xce   :  { %v107_v14 = vpop.f32.mrf.mxu0  ;;  %v115_v15 = vpop.f32.mrf.mxu1 }
  0xcf   :  { %v108_v17 = vadd.f32 %v173_v7, %v107_v14  ;;  %v116_v18 = vadd.f32 %v173_v7, %v115_v15 }
  0xd0   :  { %v215_v19 = vpop.f32.mrf.mxu0  ;;  %v219_v20 = vpop.f32.mrf.mxu1 }
  0xd1   :  { %v127_v22 = vmax.f32 %v108_v17, 0.0  ;;  %v129_v23 = vmax.f32 %v116_v18, 0.0 }
  0xd2   :  { %v120_v24 = vpop.f32.mrf.mxu1 }
  0xd3   :  { %v195_v25 = vpack.c.bf16 %v127_v22, %v126_v16  ;;  %v200_v26 = vpack.c.bf16 %v129_v23, %v128_v21  ;;  %v121_v27 = vadd.f32 %v173_v7, %v120_v24 }
  0xd4   :  { %v222_v28 = vpop.f32.mrf.mxu1 }
  0xd5   :  { %196 = vst [vmem:[#allocation2] sm:$0xff] %v195_v25   ;;  %202 = vst [vmem:[#allocation2 + $0x8] sm:$0xff] %v200_v26   ;;  %v130_v29 = vmax.f32 %v121_v27, 0.0 }
  0xd6   :  { %v123_v30 = vpop.f32.mrf.mxu1 }
  0xd7   :  { %v191_v31 = vpack.c.bf16 %v130_v29, %v130_v29 }
  0xd8   :  { %v223_v32 = vpop.f32.mrf.mxu1 }
  0xd9   :  { %156 = vst [vmem:[#allocation2 + $0x10] sm:$0xf] %v191_v31 }
  0xda   :  { %249 = shalt.err (!%p246_p4)
}
  0xdb   :  { %s263_s24 = smov 64   ;;  %s264_s25 = smov 4  }
  0xdc   :  { %168 = dma.vmem_to_hbm [thread:$0]  %s163_s2, 320, %s312_s3, [#allocation3], %s263_s24, %s263_s24, %s264_s25  }
  0xdd   :  { %258 = dma.done.wait [#allocation3], 320  }
  0xde   :  { %259 = vsyncadd [#allocation3], 4294966976 }
  0xdf   :  { %172 = vsyncpa [#allocation3], 1 }

</bundles_post_ra>
